<compile_context>
chip_gen: v7x
topology: tpu7x:2x2x1
jax: 0.10.0
libtpu: 0.0.40
codegen_flags: <defaults>
</compile_context>

<pallas_src>
import functools

import numpy as np
import jax
import jax.numpy as jnp
from jax.experimental import pallas as pl
from jax.experimental.pallas import tpu as pltpu

# ------------------------- STFT constants (module hard-codes these) ----------
N_FFT = 1024
HOP = 160
WIN = 1024
PAD = (N_FFT - HOP) // 2          # 432 (reflect pad, center=False framing)
N_FREQ = N_FFT // 2 + 1           # 513 (onesided)

N_CHUNKS = 7                      # ceil(1024 / 160)
K_SAMPLES = N_CHUNKS * HOP        # 1120 (matmul K; weight rows 1024..1119 are 0)
HALF = 512
N_COLS = 2 * HALF                 # 1024 lane-dense columns:
                                  #   cols   0..511 : re bins 0..511
                                  #   col    512    : re bin 512 (Nyquist, im==0)
                                  #   cols 513..1023: im bins 1..511 (im bin 0 == 0)
HALO = 8                          # extra HOP-chunk rows per frame tile
TILE_F = 256                      # frames per grid step (v6e can use 512)

TILE_R = 256                      # kernel-2 rows per grid step
LANE_R = 512                      # kernel-2 lane width (block = 512 KiB per ref)


# ------------------------- packed DFT weights (hann-windowed) ----------------
@functools.lru_cache(maxsize=1)
def _dft_weight_packed():
    n = np.arange(N_FFT, dtype=np.float64)
    window = 0.5 - 0.5 * np.cos(2.0 * np.pi * n / WIN)   # torch.hann_window (periodic)
    w = np.zeros((K_SAMPLES, N_COLS), np.float64)
    k_re = np.arange(HALF, dtype=np.float64)             # bins 0..511 (real)
    w[:N_FFT, :HALF] = window[:, None] * np.cos(
        2.0 * np.pi * np.outer(n, k_re) / N_FFT)
    # Nyquist bin 512 (real part only; its imaginary part is exactly 0).
    w[:N_FFT, HALF] = window * np.cos(2.0 * np.pi * n * (N_FFT // 2) / N_FFT)
    k_im = np.arange(1, HALF, dtype=np.float64)          # bins 1..511 (imag)
    w[:N_FFT, HALF + 1:] = window[:, None] * np.sin(
        2.0 * np.pi * np.outer(n, k_im) / N_FFT)
    # rows 1024..1119 stay zero (remainder of the 7th HOP-chunk)
    return jnp.asarray(w.astype(np.float32), dtype=jnp.bfloat16)


# ------------------------- wrapper-side window building ----------------------
def _frame_windows(y, tile_f=TILE_F):
    """y: (B, T) f32 -> windows (B, n_tiles, tile_f+HALO, HOP), n_frames, n_tiles.

    HOP-wide chunk rows of the reflect-padded waveform; frame f of a tile only
    needs chunk rows [f, f+6], so each tile carries a small halo (~3%
    duplication instead of 6.4x full frame duplication).
    """
    B, T = y.shape
    y_pad = jnp.pad(y, ((0, 0), (PAD, PAD)), mode="reflect")
    t_pad = T + 2 * PAD
    n_frames = (t_pad - N_FFT) // HOP + 1                 # torch.stft, center=False
    n_tiles = pl.cdiv(n_frames, tile_f)
    n_rows = n_tiles * tile_f + HALO
    y_pad = jnp.pad(y_pad, ((0, 0), (0, n_rows * HOP - t_pad)))   # zero tail
    chunks = y_pad.reshape(B, n_rows, HOP)
    idx = (np.arange(n_tiles)[:, None] * tile_f
           + np.arange(tile_f + HALO)[None, :])           # (n_tiles, tile_f+HALO)
    windows = chunks[:, idx, :]                           # (B, n_tiles, tile_f+HALO, HOP)
    return windows, n_frames, n_tiles


# ------------------------- Kernel 1: fused spectral L1 loss ------------------
def _make_spec_kernel(n_frames, tile_f):
    def kernel(wy_ref, wg_ref, w_ref, out_ref):
        # wy_ref / wg_ref : (1, 1, tile_f+HALO, HOP) f32 window chunk rows
        # w_ref           : (K_SAMPLES, N_COLS) bf16 packed DFT basis
        # out_ref         : (1, 1, 8, 128) f32 per-tile partial L1 sum

        # Assemble (tile_f, 1120) frame tiles: frame f <- chunk rows f..f+6.
        fy = jnp.concatenate(
            [wy_ref[0, 0, q:q + tile_f, :] for q in range(N_CHUNKS)], axis=1)
        fg = jnp.concatenate(
            [wg_ref[0, 0, q:q + tile_f, :] for q in range(N_CHUNKS)], axis=1)
        # Stack y and g along M and cast once -> one MXU matmul for both spectra.
        x = jnp.concatenate([fy, fg], axis=0).astype(jnp.bfloat16)  # (2*tile_f, 1120)
        acc = jnp.dot(x, w_ref[...],
                      preferred_element_type=jnp.float32)           # (2*tile_f, 1024)

        sq = acc * acc
        re_sq = sq[:, :HALF]           # re_k^2  for k = 0..511
        ot_sq = sq[:, HALF:]           # [nyq^2, im_1^2 .. im_511^2]

        # bins 0..511:  |X_k|^2 = re_k^2 + im_k^2   (im_0 == 0 -> mask col 0,
        # which holds the Nyquist real part instead).
        col = jax.lax.broadcasted_iota(jnp.int32, (1, HALF), 1)
        pw = re_sq + jnp.where(col > 0, ot_sq, 0.0) + 1e-9
        # log(max(sqrt(p), 1e-5)) == 0.5*log(max(p, 1e-10))  (no sqrt needed)
        ls = 0.5 * jnp.log(jnp.maximum(pw, 1e-10))
        # bin 512 (Nyquist): real only.
        pw_ny = ot_sq[:, 0:1] + 1e-9
        ls_ny = 0.5 * jnp.log(jnp.maximum(pw_ny, 1e-10))

        diff = jnp.abs(ls[:tile_f] - ls[tile_f:])            # (tile_f, 512)
        diff_ny = jnp.abs(ls_ny[:tile_f] - ls_ny[tile_f:])   # (tile_f, 1)

        # mask frames past the true frame count (zero-padded tail frames)
        fid = (pl.program_id(1) * tile_f
               + jax.lax.broadcasted_iota(jnp.int32, (tile_f, 1), 0))
        valid = fid < n_frames
        partial = (jnp.sum(jnp.where(valid, diff, 0.0))
                   + jnp.sum(jnp.where(valid, diff_ny, 0.0)))

        # lane-dense (8,128) output tile: scalar at [0,0], zeros elsewhere
        r = jax.lax.broadcasted_iota(jnp.int32, (8, 128), 0)
        c = jax.lax.broadcasted_iota(jnp.int32, (8, 128), 1)
        out_ref[0, 0] = jnp.where((r == 0) & (c == 0), partial, 0.0)

    return kernel


def spectral_l1_sum(win_y, win_g, w_packed, n_frames, tile_f=TILE_F):
    B, n_tiles, rows, hop = win_y.shape
    kernel = _make_spec_kernel(n_frames, tile_f)

    flops = 2 * B * n_tiles * (2 * tile_f) * K_SAMPLES * N_COLS
    transcendentals = B * n_tiles * (2 * tile_f) * (HALF + 1)
    bytes_accessed = (int(win_y.size) * 4 + int(win_g.size) * 4
                      + int(w_packed.size) * 2 + B * n_tiles * 8 * 128 * 4)

    out = pl.pallas_call(
        kernel,
        out_shape=jax.ShapeDtypeStruct((B, n_tiles, 8, 128), jnp.float32),
        grid=(B, n_tiles),
        in_specs=[
            pl.BlockSpec((1, 1, rows, hop), lambda b, j: (b, j, 0, 0)),
            pl.BlockSpec((1, 1, rows, hop), lambda b, j: (b, j, 0, 0)),
            # Constant block index -> DMA'd once; kept double-buffered for safety.
            pl.BlockSpec((K_SAMPLES, N_COLS), lambda b, j: (0, 0)),
        ],
        out_specs=pl.BlockSpec((1, 1, 8, 128), lambda b, j: (b, j, 0, 0)),
        compiler_params=pltpu.CompilerParams(
            dimension_semantics=("parallel", "parallel"),
            vmem_limit_bytes=48 * 1024 * 1024),
        cost_estimate=pl.CostEstimate(flops=int(flops),
                                      transcendentals=int(transcendentals),
                                      bytes_accessed=int(bytes_accessed)),
    )(win_y, win_g, w_packed)
    return jnp.sum(out)


# ------------------------- Kernel 2: rec-loss / KL reductions ----------------
def _l1_sum_kernel(a_ref, b_ref, out_ref):
    s = jnp.sum(jnp.abs(a_ref[...] - b_ref[...]))
    r = jax.lax.broadcasted_iota(jnp.int32, (8, 128), 0)
    c = jax.lax.broadcasted_iota(jnp.int32, (8, 128), 1)
    out_ref[0] = jnp.where((r == 0) & (c == 0), s, 0.0)


def _kl_sum_kernel(mu_ref, lv_ref, out_ref):
    mu = mu_ref[...]
    lv = jnp.clip(lv_ref[...], -30.0, 20.0)          # DiagonalGaussian clamp
    s = jnp.sum(0.5 * (mu * mu + jnp.exp(lv) - 1.0 - lv))
    r = jax.lax.broadcasted_iota(jnp.int32, (8, 128), 0)
    c = jax.lax.broadcasted_iota(jnp.int32, (8, 128), 1)
    out_ref[0] = jnp.where((r == 0) & (c == 0), s, 0.0)


def _to_row_tiles(x):
    flat = x.reshape(-1).astype(jnp.float32)
    n_tiles = max(1, pl.cdiv(flat.shape[0], TILE_R * LANE_R))
    flat = jnp.pad(flat, (0, n_tiles * TILE_R * LANE_R - flat.shape[0]))  # zero pad is loss-neutral
    return flat.reshape(n_tiles * TILE_R, LANE_R), n_tiles


def _tiled_pair_sum(kernel, a, b):
    """Sum-reduce kernel(a, b) over lane-dense row tiles sized to THESE tensors."""
    a2, n_tiles = _to_row_tiles(a)
    b2, _ = _to_row_tiles(b)
    parts = pl.pallas_call(
        kernel,
        out_shape=jax.ShapeDtypeStruct((n_tiles, 8, 128), jnp.float32),
        grid=(n_tiles,),
        in_specs=[pl.BlockSpec((TILE_R, LANE_R), lambda i: (i, 0)),
                  pl.BlockSpec((TILE_R, LANE_R), lambda i: (i, 0))],
        out_specs=pl.BlockSpec((1, 8, 128), lambda i: (i, 0, 0)),
        compiler_params=pltpu.CompilerParams(
            dimension_semantics=("parallel",)),
    )(a2, b2)
    return jnp.sum(parts)


# ------------------------- Forward (optimizer_idx == 0) ----------------------
def waveform_panns_loss_forward(inputs, reconstructions,
                                post_mean, post_logvar,
                                waveform, rec_waveform,
                                global_step,
                                disc_start=1, kl_weight=1.0,
                                disc_factor=1.0, panns_distance_weight=1.0,
                                split="train"):
    """Generator-branch forward of WaveformPANNsDiscriminatorLoss."""
    # --- rec_loss + kl_loss (independently sized tiled reductions) ---
    rec_sum = _tiled_pair_sum(_l1_sum_kernel, inputs, reconstructions)
    kl_sum = _tiled_pair_sum(_kl_sum_kernel, post_mean, post_logvar)
    rec_loss = rec_sum / jnp.float32(inputs.size)
    kl_loss = kl_sum / jnp.float32(post_mean.shape[0])

    # --- spectral loss (Pallas kernel 1): loss_spec = 45 * L1(log|STFT|) ---
    w_packed = _dft_weight_packed()
    y = jnp.squeeze(waveform, axis=1).astype(jnp.float32)       # (B, T)
    g = jnp.squeeze(rec_waveform, axis=1).astype(jnp.float32)   # (B, T)
    win_y, n_frames, _ = _frame_windows(y)
    win_g, _, _ = _frame_windows(g)
    spec_abs_sum = spectral_l1_sum(win_y, win_g, w_packed, n_frames)
    B = y.shape[0]
    loss_spec = 45.0 * spec_abs_sum / jnp.float32(B * n_frames * N_FREQ)

    # --- adopt_weight(disc_factor, global_step, threshold=disc_start) ---
    disc_factor_eff = jnp.where(global_step >= disc_start,
                                jnp.float32(disc_factor), jnp.float32(0.0))

    # TODO(synk): MultiPeriodDiscriminator / MultiScaleDiscriminator generator
    # and feature-matching losses are external pretrained modules (definitions
    # not part of this module); their contribution is omitted.
    disc_gen_loss = jnp.float32(0.0) * disc_factor_eff
    # TODO(synk): Panns_distance (pretrained CNN14 perceptual distance) is an
    # external module; its contribution is omitted.
    panns_distance_loss = jnp.float32(0.0)

    total = (loss_spec + disc_gen_loss + kl_loss * kl_weight + rec_loss
             + panns_distance_loss * panns_distance_weight)

    log = {
        f"{split}/stftloss": loss_spec,
        f"{split}/disc_gen_loss": disc_gen_loss,
        f"{split}/kl_loss": kl_loss,
        f"{split}/rec_loss": rec_loss,
        f"{split}/panns_loss": panns_distance_loss,
    }
    return total, log


# ------------------------- demo ---------------------------------------------
if __name__ == "__main__":
    key = jax.random.PRNGKey(0)
    k1, k2, k3, k4, k5, k6 = jax.random.split(key, 6)

    # small shapes consistent with the module's forward
    B, C, H, W = 2, 4, 16, 16        # mel-spectrogram-like latents (NCHW)
    Cz, Hz, Wz = 8, 4, 4             # posterior latent (NCHW)
    T = 1760                         # short waveform (> reflect pad of 432)

    inputs = jax.random.normal(k1, (B, C, H, W), jnp.float32)
    reconstructions = jax.random.normal(k2, (B, C, H, W), jnp.float32)
    post_mean = 0.1 * jax.random.normal(k3, (B, Cz, Hz, Wz), jnp.float32)
    post_logvar = 0.1 * jax.random.normal(k4, (B, Cz, Hz, Wz), jnp.float32)
    waveform = 0.5 * jnp.tanh(jax.random.normal(k5, (B, 1, T), jnp.float32))
    rec_waveform = 0.5 * jnp.tanh(jax.random.normal(k6, (B, 1, T), jnp.float32))

    total, log = waveform_panns_loss_forward(
        inputs, reconstructions, post_mean, post_logvar,
        waveform, rec_waveform, global_step=10, disc_start=1)

    jax.block_until_ready(total)
    for v in log.values():
        jax.block_until_ready(v)
    print("KERNEL_OK")
</pallas_src>

<mosaic_0001>
module attributes {stable_mosaic.version = 11 : i64} {
  func.func @_l1_sum_kernel(%arg0: i32, %arg1: memref<256x512xf32, #tpu.memory_space<vmem>>, %arg2: memref<256x512xf32, #tpu.memory_space<vmem>>, %arg3: memref<1x8x128xf32, #tpu.memory_space<vmem>>) attributes {dimension_semantics = [#tpu.dimension_semantics<parallel>], iteration_bounds = array<i64: 1>, scalar_prefetch = 0 : i64, scratch_operands = 0 : i64, tpu.core_type = #tpu.core_type<tc>, window_params = [{transform_indices = @transform_0, window_bounds = array<i64: 256, 512>}, {transform_indices = @transform_1, window_bounds = array<i64: 256, 512>}, {transform_indices = @transform_2, window_bounds = array<i64: 1, 8, 128>}]} {
    %c0 = arith.constant 0 : index
    %c0_0 = arith.constant 0 : index
    %0 = vector.load %arg1[%c0, %c0_0] : memref<256x512xf32, #tpu.memory_space<vmem>>, vector<256x512xf32>
    %c0_1 = arith.constant 0 : index
    %c0_2 = arith.constant 0 : index
    %1 = vector.load %arg2[%c0_1, %c0_2] : memref<256x512xf32, #tpu.memory_space<vmem>>, vector<256x512xf32>
    %2 = arith.subf %0, %1 : vector<256x512xf32>
    %3 = math.absf %2 : vector<256x512xf32>
    %4 = vector.shape_cast %3 : vector<256x512xf32> to vector<1x256x512xf32>
    %cst = arith.constant dense<0.000000e+00> : vector<1xf32>
    %5 = vector.multi_reduction <add>, %4, %cst [1, 2] : vector<1x256x512xf32> to vector<1xf32>
    %6 = vector.shape_cast %5 : vector<1xf32> to vector<1x1x1xf32>
    %7 = vector.extract %6[0, 0, 0] : f32 from vector<1x1x1xf32>
    %8 = tpu.iota {dimensions = array<i32: 0>} : vector<8x128xi32>
    %9 = tpu.iota {dimensions = array<i32: 1>} : vector<8x128xi32>
    %c0_i32 = arith.constant 0 : i32
    %10 = vector.broadcast %c0_i32 : i32 to vector<8x128xi32>
    %11 = arith.cmpi eq, %8, %10 : vector<8x128xi32>
    %c0_i32_3 = arith.constant 0 : i32
    %12 = vector.broadcast %c0_i32_3 : i32 to vector<8x128xi32>
    %13 = arith.cmpi eq, %9, %12 : vector<8x128xi32>
    %14 = arith.andi %11, %13 : vector<8x128xi1>
    %cst_4 = arith.constant 0.000000e+00 : f32
    %15 = vector.broadcast %7 : f32 to vector<8x128xf32>
    %16 = vector.broadcast %cst_4 : f32 to vector<8x128xf32>
    %17 = arith.select %14, %15, %16 : vector<8x128xi1>, vector<8x128xf32>
    %c0_5 = arith.constant 0 : index
    %c0_6 = arith.constant 0 : index
    %c0_7 = arith.constant 0 : index
    %18 = vector.load %arg3[%c0_5, %c0_6, %c0_7] : memref<1x8x128xf32, #tpu.memory_space<vmem>>, vector<1x8x128xf32>
    %19 = vector.shape_cast %18 : vector<1x8x128xf32> to vector<8x128xf32>
    %20 = vector.shape_cast %17 : vector<8x128xf32> to vector<1x8x128xf32>
    tpu.vector_store %arg3[%c0_5, %c0_6, %c0_7], %20 {strides = array<i32>} : memref<1x8x128xf32, #tpu.memory_space<vmem>>, vector<1x8x128xf32>,
    return
  }
  func.func @transform_0(%arg0: i32) -> (i32, i32) {
    %c0_i32 = arith.constant 0 : i32
    %c0_i32_0 = arith.constant 0 : i32
    return %arg0, %c0_i32 : i32, i32
  }
  func.func @transform_1(%arg0: i32) -> (i32, i32) {
    %c0_i32 = arith.constant 0 : i32
    %c0_i32_0 = arith.constant 0 : i32
    return %arg0, %c0_i32 : i32, i32
  }
  func.func @transform_2(%arg0: i32) -> (i32, i32, i32) {
    %c0_i32 = arith.constant 0 : i32
    %c0_i32_0 = arith.constant 0 : i32
    %c0_i32_1 = arith.constant 0 : i32
    return %arg0, %c0_i32, %c0_i32_0 : i32, i32, i32
  }
}

</mosaic_0001>

<bundles_post_ra>
// kernel: tpu_custom_call.1
= control target key start
LH: loop header
LB: loop body
LE: loop exit
PB: predicated region body
PF: predicated region fallthrough
CT: control target
= control target key end

     0   :  { %7 = vsyncpa [#allocation3], 0  ;;  %s849_s0 = inlined_call_operand.hbm [shape: f32[256,512], index: 0, kind: input, shape index: {}]   ;;  %s850_s1 = inlined_call_operand.hbm [shape: f32[256,512], index: 1, kind: input, shape index: {}]   ;;  %s851_s2 = inlined_call_operand.hbm [shape: f32[1,8,128], index: 2, kind: output, shape index: {}]  }
   0x1   :  { %8 = vsyncpa [#allocation6], 0 }
   0x2   :  { %9 = vsyncpa [#allocation4], 0  ;;  %s793_s9 = smov [#allocation2]   ;;  %s721_s13 = scalar_lea.hbm %s849_s0, 16384 }
   0x3   :  { %s15_s10 = sshll.u32 %s793_s9, 4  ;;  %p722_p0 = scmp.ne.s32.totalorder %s849_s0, %s721_s13  ;;  %s16_s10 = int_to_ptr.vmem [resolvable:$true] %s15_s10 }
   0x4   :  { %p725_p1 = scmp.lt.u32.totalorder %s721_s13, %s849_s0 }
   0x6   :  { %p727_p2 = pnand %p725_p1, %p722_p0 }
   0x8   :  { %730 = shalt.err (!%p727_p2)
}
   0x9   :  { %s731_s18 = scalar_lea.vmem %s16_s10, 16384  ;;  %p736_p4 = scmp.lt.s32.totalorder %s16_s10, %s16_s10 }
   0xa   :  { %p732_p3 = scmp.ne.s32.totalorder %s16_s10, %s731_s18  ;;  %p737_p5 = scmp.lt.s32.totalorder %s731_s18, %s731_s18 }
   0xc   :  { %p738_p6 = por %p737_p5, %p736_p4 }
   0xe   :  { %p739_p7 = pnand %p738_p6, %p732_p3 }
  0x10   :  { %742 = shalt.err (!%p739_p7)
}
  0x11   :  { %s794_s19 = smov 512   ;;  %s795_s20 = smov 32  }
  0x12   :  { %21 = dma.hbm_to_vmem [thread:$0]  %s849_s0, 16384, %s16_s10, [#allocation3], %s794_s19, %s794_s19, %s795_s20  }
  0x13   :  { %s796_s23 = smov [#allocation5]   ;;  %s743_s27 = scalar_lea.hbm %s850_s1, 16384 }
  0x14   :  { %s27_s24 = sshll.u32 %s796_s23, 4  ;;  %p744_p8 = scmp.ne.s32.totalorder %s850_s1, %s743_s27  ;;  %s28_s24 = int_to_ptr.vmem [resolvable:$true] %s27_s24 }
  0x15   :  { %p747_p9 = scmp.lt.u32.totalorder %s743_s27, %s850_s1 }
  0x17   :  { %p749_p10 = pnand %p747_p9, %p744_p8 }
  0x19   :  { %752 = shalt.err (!%p749_p10)
}
  0x1a   :  { %s753_s4 = scalar_lea.vmem %s28_s24, 16384  ;;  %p758_p12 = scmp.lt.s32.totalorder %s28_s24, %s28_s24 }
  0x1b   :  { %p754_p11 = scmp.ne.s32.totalorder %s28_s24, %s753_s4  ;;  %p759_p13 = scmp.lt.s32.totalorder %s753_s4, %s753_s4 }
  0x1d   :  { %p760_p0 = por %p759_p13, %p758_p12 }
  0x1f   :  { %p761_p1 = pnand %p760_p0, %p754_p11 }
  0x21   :  { %764 = shalt.err (!%p761_p1)
}
  0x22   :  { %33 = dma.hbm_to_vmem [thread:$0]  %s850_s1, 16384, %s28_s24, [#allocation6], %s794_s19, %s794_s19, %s795_s20  }
  0x23   :  { %787 = dma.done.wait [#allocation3], 16384  }
  0x24   :  { %788 = vsyncadd [#allocation3], 4294950912 }
  0x25   :  { %789 = dma.done.wait [#allocation6], 16384  }
  0x26   :  { %790 = vsyncadd [#allocation6], 4294950912  ;;  %v40_v0 = vld [vmem:[#allocation2] sm:$0xff]  ;;  %v41_v1 = vld [vmem:[#allocation2 + $0x8] sm:$0xff]  ;;  %s797_s1 = smov [#allocation7]  }
  0x27   :  { %v168_v2 = vld [vmem:[#allocation5] sm:$0xff]  ;;  %v169_v3 = vld [vmem:[#allocation5 + $0x8] sm:$0xff]  ;;  %v42_v4 = vld [vmem:[#allocation2 + $0x10] sm:$0xff]  ;;  %s704_s6 = sshll.u32 %s797_s1, 4  ;;  %s705_s6 = int_to_ptr.vmem [resolvable:$true] %s704_s6 }
  0x28   :  { %v170_v5 = vld [vmem:[#allocation5 + $0x10] sm:$0xff]  ;;  %v296_v6 = vsub.f32 %v40_v0, %v168_v2  ;;  %v297_v7 = vsub.f32 %v41_v1, %v169_v3  ;;  %v43_v8 = vld [vmem:[#allocation2 + $0x18] sm:$0xff]  ;;  %v44_v11 = vld [vmem:[#allocation2 + $0x20] sm:$0xff]  ;;  %s765_s8 = scalar_lea.vmem %s705_s6, 128  ;;  %p770_p3 = scmp.lt.s32.totalorder %s705_s6, %s705_s6 }
  0x29   :  { %v171_v9 = vld [vmem:[#allocation5 + $0x18] sm:$0xff]  ;;  %v298_v10 = vsub.f32 %v42_v4, %v170_v5  ;;  %v172_v12 = vld [vmem:[#allocation5 + $0x20] sm:$0xff]  ;;  %v45_v16 = vld [vmem:[#allocation2 + $0x28] sm:$0xff]  ;;  %p766_p2 = scmp.ne.s32.totalorder %s705_s6, %s765_s8  ;;  %p771_p4 = scmp.lt.s32.totalorder %s765_s8, %s765_s8 }
  0x2a   :  { %v299_v13 = vsub.f32 %v43_v8, %v171_v9  ;;  %v424_v14 = vand.u32 2147483647, %v296_v6  ;;  %v425_v15 = vand.u32 2147483647, %v297_v7  ;;  %v173_v17 = vld [vmem:[#allocation5 + $0x28] sm:$0xff]  ;;  %v300_v18 = vsub.f32 %v44_v11, %v172_v12  ;;  %v46_v20 = vld [vmem:[#allocation2 + $0x30] sm:$0xff] }
  0x2b   :  { %v426_v19 = vand.u32 2147483647, %v298_v10  ;;  %v174_v21 = vld [vmem:[#allocation5 + $0x30] sm:$0xff]  ;;  %v301_v22 = vsub.f32 %v45_v16, %v173_v17  ;;  %v47_v25 = vld [vmem:[#allocation2 + $0x38] sm:$0xff]  ;;  %v48_v30 = vld [vmem:[#allocation2 + $0x40] sm:$0xff]  ;;  %p772_p5 = por %p771_p4, %p770_p3 }
  0x2c   :  { %v427_v23 = vand.u32 2147483647, %v299_v13  ;;  %v552_v24 = vadd.f32 %v425_v15, %v424_v14  ;;  %v175_v26 = vld [vmem:[#allocation5 + $0x38] sm:$0xff]  ;;  %v302_v27 = vsub.f32 %v46_v20, %v174_v21  ;;  %v428_v28 = vand.u32 2147483647, %v300_v18  ;;  %v176_v31 = vld [vmem:[#allocation5 + $0x40] sm:$0xff] }
  0x2d   :  { %v303_v32 = vsub.f32 %v47_v25, %v175_v26  ;;  %v429_v33 = vand.u32 2147483647, %v301_v22  ;;  %v49_v35 = vld [vmem:[#allocation2 + $0x48] sm:$0xff]  ;;  %v304_v37 = vsub.f32 %v48_v30, %v176_v31  ;;  %v50_v40 = vld [vmem:[#allocation2 + $0x50] sm:$0xff]  ;;  %v51_v45 = vld [vmem:[#allocation2 + $0x58] sm:$0xff]  ;;  %p773_p6 = pnand %p772_p5, %p766_p2 }
  0x2e   :  { %v553_v29 = vadd.f32 %v552_v24, %v426_v19  ;;  %v177_v36 = vld [vmem:[#allocation5 + $0x48] sm:$0xff]  ;;  %v430_v38 = vand.u32 2147483647, %v302_v27  ;;  %v178_v41 = vld [vmem:[#allocation5 + $0x50] sm:$0xff]  ;;  %v179_v46 = vld [vmem:[#allocation5 + $0x58] sm:$0xff] }
  0x2f   :  { %v305_v42 = vsub.f32 %v49_v35, %v177_v36  ;;  %v431_v43 = vand.u32 2147483647, %v303_v32  ;;  %v306_v47 = vsub.f32 %v50_v40, %v178_v41  ;;  %v432_v48 = vand.u32 2147483647, %v304_v37  ;;  %v52_v50 = vld [vmem:[#allocation2 + $0x60] sm:$0xff]  ;;  %v53_v55 = vld [vmem:[#allocation2 + $0x68] sm:$0xff] }
  0x30   :  { %v554_v34 = vadd.f32 %v553_v29, %v427_v23  ;;  %v180_v51 = vld [vmem:[#allocation5 + $0x60] sm:$0xff]  ;;  %v307_v52 = vsub.f32 %v51_v45, %v179_v46  ;;  %v181_v56 = vld [vmem:[#allocation5 + $0x68] sm:$0xff]  ;;  %v54_v60 = vld [vmem:[#allocation2 + $0x70] sm:$0xff] }
  0x31   :  { %v433_v53 = vand.u32 2147483647, %v305_v42  ;;  %v308_v57 = vsub.f32 %v52_v50, %v180_v51  ;;  %v434_v58 = vand.u32 2147483647, %v306_v47  ;;  %v182_v61 = vld [vmem:[#allocation5 + $0x70] sm:$0xff]  ;;  %v309_v62 = vsub.f32 %v53_v55, %v181_v56  ;;  %v55_v1 = vld [vmem:[#allocation2 + $0x78] sm:$0xff] }
  0x32   :  { %v555_v39 = vadd.f32 %v554_v34, %v428_v28  ;;  %v435_v63 = vand.u32 2147483647, %v307_v52  ;;  %v183_v2 = vld [vmem:[#allocation5 + $0x78] sm:$0xff]  ;;  %v310_v3 = vsub.f32 %v54_v60, %v182_v61  ;;  %v56_v6 = vld [vmem:[#allocation2 + $0x80] sm:$0xff]  ;;  %v57_v11 = vld [vmem:[#allocation2 + $0x88] sm:$0xff] }
  0x33   :  { %v436_v4 = vand.u32 2147483647, %v308_v57  ;;  %v184_v7 = vld [vmem:[#allocation5 + $0x80] sm:$0xff]  ;;  %v311_v8 = vsub.f32 %v55_v1, %v183_v2  ;;  %v437_v9 = vand.u32 2147483647, %v309_v62  ;;  %v185_v12 = vld [vmem:[#allocation5 + $0x88] sm:$0xff] }
  0x34   :  { %v556_v44 = vadd.f32 %v555_v39, %v429_v33  ;;  %v312_v13 = vsub.f32 %v56_v6, %v184_v7  ;;  %v438_v14 = vand.u32 2147483647, %v310_v3  ;;  %v58_v16 = vld [vmem:[#allocation2 + $0x90] sm:$0xff]  ;;  %v313_v18 = vsub.f32 %v57_v11, %v185_v12  ;;  %v59_v21 = vld [vmem:[#allocation2 + $0x98] sm:$0xff]  ;;  %v60_v26 = vld [vmem:[#allocation2 + $0xa0] sm:$0xff] }
  0x35   :  { %v186_v17 = vld [vmem:[#allocation5 + $0x90] sm:$0xff]  ;;  %v439_v19 = vand.u32 2147483647, %v311_v8  ;;  %v187_v22 = vld [vmem:[#allocation5 + $0x98] sm:$0xff]  ;;  %v188_v27 = vld [vmem:[#allocation5 + $0xa0] sm:$0xff] }
  0x36   :  { %v557_v49 = vadd.f32 %v556_v44, %v430_v38  ;;  %v314_v23 = vsub.f32 %v58_v16, %v186_v17  ;;  %v440_v24 = vand.u32 2147483647, %v312_v13  ;;  %v315_v28 = vsub.f32 %v59_v21, %v187_v22  ;;  %v61_v31 = vld [vmem:[#allocation2 + $0xa8] sm:$0xff]  ;;  %v62_v36 = vld [vmem:[#allocation2 + $0xb0] sm:$0xff]  ;;  %v63_v41 = vld [vmem:[#allocation2 + $0xb8] sm:$0xff] }
  0x37   :  { %v441_v29 = vand.u32 2147483647, %v313_v18  ;;  %v189_v32 = vld [vmem:[#allocation5 + $0xa8] sm:$0xff]  ;;  %v316_v33 = vsub.f32 %v60_v26, %v188_v27  ;;  %v190_v37 = vld [vmem:[#allocation5 + $0xb0] sm:$0xff]  ;;  %v191_v42 = vld [vmem:[#allocation5 + $0xb8] sm:$0xff] }
  0x38   :  { %v558_v54 = vadd.f32 %v557_v49, %v431_v43  ;;  %v442_v34 = vand.u32 2147483647, %v314_v23  ;;  %v317_v38 = vsub.f32 %v61_v31, %v189_v32  ;;  %v443_v39 = vand.u32 2147483647, %v315_v28  ;;  %v64_v46 = vld [vmem:[#allocation2 + $0xc0] sm:$0xff]  ;;  %v65_v51 = vld [vmem:[#allocation2 + $0xc8] sm:$0xff] }
  0x39   :  { %v318_v43 = vsub.f32 %v62_v36, %v190_v37  ;;  %v444_v44 = vand.u32 2147483647, %v316_v33  ;;  %v192_v47 = vld [vmem:[#allocation5 + $0xc0] sm:$0xff]  ;;  %v193_v52 = vld [vmem:[#allocation5 + $0xc8] sm:$0xff]  ;;  %v66_v56 = vld [vmem:[#allocation2 + $0xd0] sm:$0xff] }
  0x3a   :  { %v559_v59 = vadd.f32 %v558_v54, %v432_v48  ;;  %v319_v48 = vsub.f32 %v63_v41, %v191_v42  ;;  %v445_v49 = vand.u32 2147483647, %v317_v38  ;;  %v194_v57 = vld [vmem:[#allocation5 + $0xd0] sm:$0xff]  ;;  %v67_v61 = vld [vmem:[#allocation2 + $0xd8] sm:$0xff]  ;;  %v68_v2 = vld [vmem:[#allocation2 + $0xe0] sm:$0xff] }
  0x3b   :  { %v446_v54 = vand.u32 2147483647, %v318_v43  ;;  %v195_v62 = vld [vmem:[#allocation5 + $0xd8] sm:$0xff]  ;;  %v196_v3 = vld [vmem:[#allocation5 + $0xe0] sm:$0xff]  ;;  %v69_v7 = vld [vmem:[#allocation2 + $0xe8] sm:$0xff] }
  0x3c   :  { %v560_v0 = vadd.f32 %v559_v59, %v433_v53  ;;  %v320_v53 = vsub.f32 %v64_v46, %v192_v47  ;;  %v447_v59 = vand.u32 2147483647, %v319_v48  ;;  %v197_v8 = vld [vmem:[#allocation5 + $0xe8] sm:$0xff]  ;;  %v70_v12 = vld [vmem:[#allocation2 + $0xf0] sm:$0xff]  ;;  %v71_v17 = vld [vmem:[#allocation2 + $0xf8] sm:$0xff] }
  0x3d   :  { %v198_v13 = vld [vmem:[#allocation5 + $0xf0] sm:$0xff]  ;;  %v199_v18 = vld [vmem:[#allocation5 + $0xf8] sm:$0xff]  ;;  %v72_v22 = vld [vmem:[#allocation2 + $0x100] sm:$0xff] }
  0x3e   :  { %v561_v5 = vadd.f32 %v560_v0, %v434_v58  ;;  %v321_v58 = vsub.f32 %v65_v51, %v193_v52  ;;  %v448_v0 = vand.u32 2147483647, %v320_v53  ;;  %v200_v23 = vld [vmem:[#allocation5 + $0x100] sm:$0xff]  ;;  %v73_v27 = vld [vmem:[#allocation2 + $0x108] sm:$0xff]  ;;  %v74_v32 = vld [vmem:[#allocation2 + $0x110] sm:$0xff] }
  0x3f   :  { %v201_v28 = vld [vmem:[#allocation5 + $0x108] sm:$0xff]  ;;  %v202_v33 = vld [vmem:[#allocation5 + $0x110] sm:$0xff]  ;;  %v75_v37 = vld [vmem:[#allocation2 + $0x118] sm:$0xff] }
  0x40   :  { %v562_v10 = vadd.f32 %v561_v5, %v435_v63  ;;  %v322_v63 = vsub.f32 %v66_v56, %v194_v57  ;;  %v449_v5 = vand.u32 2147483647, %v321_v58  ;;  %v203_v38 = vld [vmem:[#allocation5 + $0x118] sm:$0xff]  ;;  %v76_v42 = vld [vmem:[#allocation2 + $0x120] sm:$0xff]  ;;  %v77_v47 = vld [vmem:[#allocation2 + $0x128] sm:$0xff] }
  0x41   :  { %v204_v43 = vld [vmem:[#allocation5 + $0x120] sm:$0xff]  ;;  %v205_v48 = vld [vmem:[#allocation5 + $0x128] sm:$0xff]  ;;  %v78_v52 = vld [vmem:[#allocation2 + $0x130] sm:$0xff] }
  0x42   :  { %v563_v15 = vadd.f32 %v562_v10, %v436_v4  ;;  %v323_v4 = vsub.f32 %v67_v61, %v195_v62  ;;  %v450_v10 = vand.u32 2147483647, %v322_v63  ;;  %v206_v53 = vld [vmem:[#allocation5 + $0x130] sm:$0xff]  ;;  %v79_v57 = vld [vmem:[#allocation2 + $0x138] sm:$0xff]  ;;  %v80_v62 = vld [vmem:[#allocation2 + $0x140] sm:$0xff] }
  0x43   :  { %v207_v58 = vld [vmem:[#allocation5 + $0x138] sm:$0xff]  ;;  %v208_v63 = vld [vmem:[#allocation5 + $0x140] sm:$0xff] }
  0x44   :  { %v564_v20 = vadd.f32 %v563_v15, %v437_v9  ;;  %v324_v9 = vsub.f32 %v68_v2, %v196_v3  ;;  %v451_v15 = vand.u32 2147483647, %v323_v4  ;;  %v81_v3 = vld [vmem:[#allocation2 + $0x148] sm:$0xff] }
  0x45   :  { %v209_v4 = vld [vmem:[#allocation5 + $0x148] sm:$0xff] }
  0x46   :  { %v565_v25 = vadd.f32 %v564_v20, %v438_v14  ;;  %v325_v14 = vsub.f32 %v69_v7, %v197_v8  ;;  %v452_v20 = vand.u32 2147483647, %v324_v9  ;;  %v82_v8 = vld [vmem:[#allocation2 + $0x150] sm:$0xff] }
  0x47   :  { %v210_v9 = vld [vmem:[#allocation5 + $0x150] sm:$0xff] }
  0x48   :  { %v566_v30 = vadd.f32 %v565_v25, %v439_v19  ;;  %v326_v19 = vsub.f32 %v70_v12, %v198_v13  ;;  %v453_v25 = vand.u32 2147483647, %v325_v14  ;;  %v83_v13 = vld [vmem:[#allocation2 + $0x158] sm:$0xff] }
  0x49   :  { %v211_v14 = vld [vmem:[#allocation5 + $0x158] sm:$0xff] }
  0x4a   :  { %v567_v35 = vadd.f32 %v566_v30, %v440_v24  ;;  %v327_v24 = vsub.f32 %v71_v17, %v199_v18  ;;  %v454_v30 = vand.u32 2147483647, %v326_v19  ;;  %v84_v18 = vld [vmem:[#allocation2 + $0x160] sm:$0xff] }
  0x4b   :  { %v212_v19 = vld [vmem:[#allocation5 + $0x160] sm:$0xff] }
  0x4c   :  { %v568_v40 = vadd.f32 %v567_v35, %v441_v29  ;;  %v328_v29 = vsub.f32 %v72_v22, %v200_v23  ;;  %v455_v35 = vand.u32 2147483647, %v327_v24  ;;  %v85_v23 = vld [vmem:[#allocation2 + $0x168] sm:$0xff] }
  0x4d   :  { %v213_v24 = vld [vmem:[#allocation5 + $0x168] sm:$0xff] }
  0x4e   :  { %v569_v45 = vadd.f32 %v568_v40, %v442_v34  ;;  %v329_v34 = vsub.f32 %v73_v27, %v201_v28  ;;  %v456_v40 = vand.u32 2147483647, %v328_v29  ;;  %v86_v28 = vld [vmem:[#allocation2 + $0x170] sm:$0xff] }
  0x4f   :  { %v214_v29 = vld [vmem:[#allocation5 + $0x170] sm:$0xff] }
  0x50   :  { %v570_v50 = vadd.f32 %v569_v45, %v443_v39  ;;  %v330_v39 = vsub.f32 %v74_v32, %v202_v33  ;;  %v457_v45 = vand.u32 2147483647, %v329_v34  ;;  %v87_v33 = vld [vmem:[#allocation2 + $0x178] sm:$0xff] }
  0x51   :  { %v215_v34 = vld [vmem:[#allocation5 + $0x178] sm:$0xff] }
  0x52   :  { %v571_v55 = vadd.f32 %v570_v50, %v444_v44  ;;  %v331_v44 = vsub.f32 %v75_v37, %v203_v38  ;;  %v458_v50 = vand.u32 2147483647, %v330_v39  ;;  %v88_v38 = vld [vmem:[#allocation2 + $0x180] sm:$0xff] }
  0x53   :  { %v216_v39 = vld [vmem:[#allocation5 + $0x180] sm:$0xff] }
  0x54   :  { %v572_v60 = vadd.f32 %v571_v55, %v445_v49  ;;  %v332_v49 = vsub.f32 %v76_v42, %v204_v43  ;;  %v459_v55 = vand.u32 2147483647, %v331_v44  ;;  %v89_v43 = vld [vmem:[#allocation2 + $0x188] sm:$0xff] }
  0x55   :  { %v217_v44 = vld [vmem:[#allocation5 + $0x188] sm:$0xff] }
  0x56   :  { %v573_v1 = vadd.f32 %v572_v60, %v446_v54  ;;  %v333_v54 = vsub.f32 %v77_v47, %v205_v48  ;;  %v460_v60 = vand.u32 2147483647, %v332_v49  ;;  %v90_v48 = vld [vmem:[#allocation2 + $0x190] sm:$0xff] }
  0x57   :  { %v218_v49 = vld [vmem:[#allocation5 + $0x190] sm:$0xff] }
  0x58   :  { %v574_v6 = vadd.f32 %v573_v1, %v447_v59  ;;  %v334_v59 = vsub.f32 %v78_v52, %v206_v53  ;;  %v461_v1 = vand.u32 2147483647, %v333_v54  ;;  %v91_v53 = vld [vmem:[#allocation2 + $0x198] sm:$0xff] }
  0x59   :  { %v219_v54 = vld [vmem:[#allocation5 + $0x198] sm:$0xff] }
  0x5a   :  { %v575_v11 = vadd.f32 %v574_v6, %v448_v0  ;;  %v335_v0 = vsub.f32 %v79_v57, %v207_v58  ;;  %v462_v6 = vand.u32 2147483647, %v334_v59  ;;  %v92_v58 = vld [vmem:[#allocation2 + $0x1a0] sm:$0xff] }
  0x5b   :  { %v220_v59 = vld [vmem:[#allocation5 + $0x1a0] sm:$0xff] }
  0x5c   :  { %v576_v16 = vadd.f32 %v575_v11, %v449_v5  ;;  %v336_v5 = vsub.f32 %v80_v62, %v208_v63  ;;  %v463_v11 = vand.u32 2147483647, %v335_v0  ;;  %v93_v63 = vld [vmem:[#allocation2 + $0x1a8] sm:$0xff] }
  0x5d   :  { %v221_v0 = vld [vmem:[#allocation5 + $0x1a8] sm:$0xff] }
  0x5e   :  { %v577_v21 = vadd.f32 %v576_v16, %v450_v10  ;;  %v337_v10 = vsub.f32 %v81_v3, %v209_v4  ;;  %v464_v16 = vand.u32 2147483647, %v336_v5  ;;  %v94_v4 = vld [vmem:[#allocation2 + $0x1b0] sm:$0xff] }
  0x5f   :  { %v222_v5 = vld [vmem:[#allocation5 + $0x1b0] sm:$0xff] }
  0x60   :  { %v578_v26 = vadd.f32 %v577_v21, %v451_v15  ;;  %v338_v15 = vsub.f32 %v82_v8, %v210_v9  ;;  %v465_v21 = vand.u32 2147483647, %v337_v10  ;;  %v95_v9 = vld [vmem:[#allocation2 + $0x1b8] sm:$0xff] }
  0x61   :  { %v223_v10 = vld [vmem:[#allocation5 + $0x1b8] sm:$0xff] }
  0x62   :  { %v579_v31 = vadd.f32 %v578_v26, %v452_v20  ;;  %v339_v20 = vsub.f32 %v83_v13, %v211_v14  ;;  %v466_v26 = vand.u32 2147483647, %v338_v15  ;;  %v96_v14 = vld [vmem:[#allocation2 + $0x1c0] sm:$0xff] }
  0x63   :  { %v224_v15 = vld [vmem:[#allocation5 + $0x1c0] sm:$0xff] }
  0x64   :  { %v580_v36 = vadd.f32 %v579_v31, %v453_v25  ;;  %v340_v25 = vsub.f32 %v84_v18, %v212_v19  ;;  %v467_v31 = vand.u32 2147483647, %v339_v20  ;;  %v97_v19 = vld [vmem:[#allocation2 + $0x1c8] sm:$0xff] }
  0x65   :  { %v225_v20 = vld [vmem:[#allocation5 + $0x1c8] sm:$0xff] }
  0x66   :  { %v581_v41 = vadd.f32 %v580_v36, %v454_v30  ;;  %v341_v30 = vsub.f32 %v85_v23, %v213_v24  ;;  %v468_v36 = vand.u32 2147483647, %v340_v25  ;;  %v98_v24 = vld [vmem:[#allocation2 + $0x1d0] sm:$0xff] }
  0x67   :  { %v226_v25 = vld [vmem:[#allocation5 + $0x1d0] sm:$0xff] }
  0x68   :  { %v582_v46 = vadd.f32 %v581_v41, %v455_v35  ;;  %v342_v35 = vsub.f32 %v86_v28, %v214_v29  ;;  %v469_v41 = vand.u32 2147483647, %v341_v30  ;;  %v99_v29 = vld [vmem:[#allocation2 + $0x1d8] sm:$0xff] }
  0x69   :  { %v227_v30 = vld [vmem:[#allocation5 + $0x1d8] sm:$0xff] }
  0x6a   :  { %v583_v51 = vadd.f32 %v582_v46, %v456_v40  ;;  %v343_v40 = vsub.f32 %v87_v33, %v215_v34  ;;  %v470_v46 = vand.u32 2147483647, %v342_v35  ;;  %v100_v34 = vld [vmem:[#allocation2 + $0x1e0] sm:$0xff] }
  0x6b   :  { %v228_v35 = vld [vmem:[#allocation5 + $0x1e0] sm:$0xff] }
  0x6c   :  { %v584_v56 = vadd.f32 %v583_v51, %v457_v45  ;;  %v344_v45 = vsub.f32 %v88_v38, %v216_v39  ;;  %v471_v51 = vand.u32 2147483647, %v343_v40  ;;  %v101_v39 = vld [vmem:[#allocation2 + $0x1e8] sm:$0xff] }
  0x6d   :  { %v229_v40 = vld [vmem:[#allocation5 + $0x1e8] sm:$0xff] }
  0x6e   :  { %v585_v61 = vadd.f32 %v584_v56, %v458_v50  ;;  %v345_v50 = vsub.f32 %v89_v43, %v217_v44  ;;  %v472_v56 = vand.u32 2147483647, %v344_v45  ;;  %v102_v44 = vld [vmem:[#allocation2 + $0x1f0] sm:$0xff] }
  0x6f   :  { %v230_v45 = vld [vmem:[#allocation5 + $0x1f0] sm:$0xff] }
  0x70   :  { %v586_v2 = vadd.f32 %v585_v61, %v459_v55  ;;  %v346_v55 = vsub.f32 %v90_v48, %v218_v49  ;;  %v473_v61 = vand.u32 2147483647, %v345_v50  ;;  %v103_v49 = vld [vmem:[#allocation2 + $0x1f8] sm:$0xff] }
  0x71   :  { %v231_v50 = vld [vmem:[#allocation5 + $0x1f8] sm:$0xff] }
  0x72   :  { %v587_v7 = vadd.f32 %v586_v2, %v460_v60  ;;  %v347_v60 = vsub.f32 %v91_v53, %v219_v54  ;;  %v474_v2 = vand.u32 2147483647, %v346_v55  ;;  %v104_v54 = vld [vmem:[#allocation2 + $0x200] sm:$0xff] }
  0x73   :  { %v232_v55 = vld [vmem:[#allocation5 + $0x200] sm:$0xff] }
  0x74   :  { %v588_v12 = vadd.f32 %v587_v7, %v461_v1  ;;  %v348_v1 = vsub.f32 %v92_v58, %v220_v59  ;;  %v475_v7 = vand.u32 2147483647, %v347_v60  ;;  %v105_v59 = vld [vmem:[#allocation2 + $0x208] sm:$0xff] }
  0x75   :  { %v233_v60 = vld [vmem:[#allocation5 + $0x208] sm:$0xff] }
  0x76   :  { %v589_v17 = vadd.f32 %v588_v12, %v462_v6  ;;  %v349_v6 = vsub.f32 %v93_v63, %v221_v0  ;;  %v476_v12 = vand.u32 2147483647, %v348_v1  ;;  %v106_v0 = vld [vmem:[#allocation2 + $0x210] sm:$0xff] }
  0x77   :  { %v234_v1 = vld [vmem:[#allocation5 + $0x210] sm:$0xff] }
  0x78   :  { %v590_v22 = vadd.f32 %v589_v17, %v463_v11  ;;  %v350_v11 = vsub.f32 %v94_v4, %v222_v5  ;;  %v477_v17 = vand.u32 2147483647, %v349_v6  ;;  %v107_v5 = vld [vmem:[#allocation2 + $0x218] sm:$0xff] }
  0x79   :  { %v235_v6 = vld [vmem:[#allocation5 + $0x218] sm:$0xff] }
  0x7a   :  { %v591_v27 = vadd.f32 %v590_v22, %v464_v16  ;;  %v351_v16 = vsub.f32 %v95_v9, %v223_v10  ;;  %v478_v22 = vand.u32 2147483647, %v350_v11  ;;  %v108_v10 = vld [vmem:[#allocation2 + $0x220] sm:$0xff] }
  0x7b   :  { %v236_v11 = vld [vmem:[#allocation5 + $0x220] sm:$0xff] }
  0x7c   :  { %v592_v32 = vadd.f32 %v591_v27, %v465_v21  ;;  %v352_v21 = vsub.f32 %v96_v14, %v224_v15  ;;  %v479_v27 = vand.u32 2147483647, %v351_v16  ;;  %v109_v15 = vld [vmem:[#allocation2 + $0x228] sm:$0xff] }
  0x7d   :  { %v237_v16 = vld [vmem:[#allocation5 + $0x228] sm:$0xff] }
  0x7e   :  { %v593_v37 = vadd.f32 %v592_v32, %v466_v26  ;;  %v353_v26 = vsub.f32 %v97_v19, %v225_v20  ;;  %v480_v32 = vand.u32 2147483647, %v352_v21  ;;  %v110_v20 = vld [vmem:[#allocation2 + $0x230] sm:$0xff] }
  0x7f   :  { %v238_v21 = vld [vmem:[#allocation5 + $0x230] sm:$0xff] }
  0x80   :  { %v594_v42 = vadd.f32 %v593_v37, %v467_v31  ;;  %v354_v31 = vsub.f32 %v98_v24, %v226_v25  ;;  %v481_v37 = vand.u32 2147483647, %v353_v26  ;;  %v111_v25 = vld [vmem:[#allocation2 + $0x238] sm:$0xff] }
  0x81   :  { %v239_v26 = vld [vmem:[#allocation5 + $0x238] sm:$0xff] }
  0x82   :  { %v595_v47 = vadd.f32 %v594_v42, %v468_v36  ;;  %v355_v36 = vsub.f32 %v99_v29, %v227_v30  ;;  %v482_v42 = vand.u32 2147483647, %v354_v31  ;;  %v112_v30 = vld [vmem:[#allocation2 + $0x240] sm:$0xff] }
  0x83   :  { %v240_v31 = vld [vmem:[#allocation5 + $0x240] sm:$0xff] }
  0x84   :  { %v596_v52 = vadd.f32 %v595_v47, %v469_v41  ;;  %v356_v41 = vsub.f32 %v100_v34, %v228_v35  ;;  %v483_v47 = vand.u32 2147483647, %v355_v36  ;;  %v113_v35 = vld [vmem:[#allocation2 + $0x248] sm:$0xff] }
  0x85   :  { %v241_v36 = vld [vmem:[#allocation5 + $0x248] sm:$0xff] }
  0x86   :  { %v597_v57 = vadd.f32 %v596_v52, %v470_v46  ;;  %v357_v46 = vsub.f32 %v101_v39, %v229_v40  ;;  %v484_v52 = vand.u32 2147483647, %v356_v41  ;;  %v114_v40 = vld [vmem:[#allocation2 + $0x250] sm:$0xff] }
  0x87   :  { %v242_v41 = vld [vmem:[#allocation5 + $0x250] sm:$0xff] }
  0x88   :  { %v598_v62 = vadd.f32 %v597_v57, %v471_v51  ;;  %v358_v51 = vsub.f32 %v102_v44, %v230_v45  ;;  %v485_v57 = vand.u32 2147483647, %v357_v46  ;;  %v115_v45 = vld [vmem:[#allocation2 + $0x258] sm:$0xff] }
  0x89   :  { %v243_v46 = vld [vmem:[#allocation5 + $0x258] sm:$0xff] }
  0x8a   :  { %v599_v3 = vadd.f32 %v598_v62, %v472_v56  ;;  %v359_v56 = vsub.f32 %v103_v49, %v231_v50  ;;  %v486_v62 = vand.u32 2147483647, %v358_v51  ;;  %v116_v50 = vld [vmem:[#allocation2 + $0x260] sm:$0xff] }
  0x8b   :  { %v244_v51 = vld [vmem:[#allocation5 + $0x260] sm:$0xff] }
  0x8c   :  { %v600_v8 = vadd.f32 %v599_v3, %v473_v61  ;;  %v360_v61 = vsub.f32 %v104_v54, %v232_v55  ;;  %v487_v3 = vand.u32 2147483647, %v359_v56  ;;  %v117_v55 = vld [vmem:[#allocation2 + $0x268] sm:$0xff] }
  0x8d   :  { %v245_v56 = vld [vmem:[#allocation5 + $0x268] sm:$0xff] }
  0x8e   :  { %v601_v13 = vadd.f32 %v600_v8, %v474_v2  ;;  %v361_v2 = vsub.f32 %v105_v59, %v233_v60  ;;  %v488_v8 = vand.u32 2147483647, %v360_v61  ;;  %v118_v60 = vld [vmem:[#allocation2 + $0x270] sm:$0xff] }
  0x8f   :  { %v246_v61 = vld [vmem:[#allocation5 + $0x270] sm:$0xff] }
  0x90   :  { %v602_v18 = vadd.f32 %v601_v13, %v475_v7  ;;  %v362_v7 = vsub.f32 %v106_v0, %v234_v1  ;;  %v489_v13 = vand.u32 2147483647, %v361_v2  ;;  %v119_v1 = vld [vmem:[#allocation2 + $0x278] sm:$0xff] }
  0x91   :  { %v247_v2 = vld [vmem:[#allocation5 + $0x278] sm:$0xff] }
  0x92   :  { %v603_v23 = vadd.f32 %v602_v18, %v476_v12  ;;  %v363_v12 = vsub.f32 %v107_v5, %v235_v6  ;;  %v490_v18 = vand.u32 2147483647, %v362_v7  ;;  %v120_v6 = vld [vmem:[#allocation2 + $0x280] sm:$0xff] }
  0x93   :  { %v248_v7 = vld [vmem:[#allocation5 + $0x280] sm:$0xff] }
  0x94   :  { %v604_v28 = vadd.f32 %v603_v23, %v477_v17  ;;  %v364_v17 = vsub.f32 %v108_v10, %v236_v11  ;;  %v491_v23 = vand.u32 2147483647, %v363_v12  ;;  %v121_v11 = vld [vmem:[#allocation2 + $0x288] sm:$0xff] }
  0x95   :  { %v249_v12 = vld [vmem:[#allocation5 + $0x288] sm:$0xff] }
  0x96   :  { %v605_v33 = vadd.f32 %v604_v28, %v478_v22  ;;  %v365_v22 = vsub.f32 %v109_v15, %v237_v16  ;;  %v492_v28 = vand.u32 2147483647, %v364_v17  ;;  %v122_v16 = vld [vmem:[#allocation2 + $0x290] sm:$0xff] }
  0x97   :  { %v250_v17 = vld [vmem:[#allocation5 + $0x290] sm:$0xff] }
  0x98   :  { %v606_v38 = vadd.f32 %v605_v33, %v479_v27  ;;  %v366_v27 = vsub.f32 %v110_v20, %v238_v21  ;;  %v493_v33 = vand.u32 2147483647, %v365_v22  ;;  %v123_v21 = vld [vmem:[#allocation2 + $0x298] sm:$0xff] }
  0x99   :  { %v251_v22 = vld [vmem:[#allocation5 + $0x298] sm:$0xff] }
  0x9a   :  { %v607_v43 = vadd.f32 %v606_v38, %v480_v32  ;;  %v367_v32 = vsub.f32 %v111_v25, %v239_v26  ;;  %v494_v38 = vand.u32 2147483647, %v366_v27  ;;  %v124_v26 = vld [vmem:[#allocation2 + $0x2a0] sm:$0xff] }
  0x9b   :  { %v252_v27 = vld [vmem:[#allocation5 + $0x2a0] sm:$0xff] }
  0x9c   :  { %v608_v48 = vadd.f32 %v607_v43, %v481_v37  ;;  %v368_v37 = vsub.f32 %v112_v30, %v240_v31  ;;  %v495_v43 = vand.u32 2147483647, %v367_v32  ;;  %v125_v31 = vld [vmem:[#allocation2 + $0x2a8] sm:$0xff] }
  0x9d   :  { %v253_v32 = vld [vmem:[#allocation5 + $0x2a8] sm:$0xff] }
  0x9e   :  { %v609_v53 = vadd.f32 %v608_v48, %v482_v42  ;;  %v369_v42 = vsub.f32 %v113_v35, %v241_v36  ;;  %v496_v48 = vand.u32 2147483647, %v368_v37  ;;  %v126_v36 = vld [vmem:[#allocation2 + $0x2b0] sm:$0xff] }
  0x9f   :  { %v254_v37 = vld [vmem:[#allocation5 + $0x2b0] sm:$0xff] }
  0xa0   :  { %v610_v58 = vadd.f32 %v609_v53, %v483_v47  ;;  %v370_v47 = vsub.f32 %v114_v40, %v242_v41  ;;  %v497_v53 = vand.u32 2147483647, %v369_v42  ;;  %v127_v41 = vld [vmem:[#allocation2 + $0x2b8] sm:$0xff] }
  0xa1   :  { %v255_v42 = vld [vmem:[#allocation5 + $0x2b8] sm:$0xff] }
  0xa2   :  { %v611_v63 = vadd.f32 %v610_v58, %v484_v52  ;;  %v371_v52 = vsub.f32 %v115_v45, %v243_v46  ;;  %v498_v58 = vand.u32 2147483647, %v370_v47  ;;  %v128_v46 = vld [vmem:[#allocation2 + $0x2c0] sm:$0xff] }
  0xa3   :  { %v256_v47 = vld [vmem:[#allocation5 + $0x2c0] sm:$0xff] }
  0xa4   :  { %v612_v4 = vadd.f32 %v611_v63, %v485_v57  ;;  %v372_v57 = vsub.f32 %v116_v50, %v244_v51  ;;  %v499_v63 = vand.u32 2147483647, %v371_v52  ;;  %v129_v51 = vld [vmem:[#allocation2 + $0x2c8] sm:$0xff] }
  0xa5   :  { %v257_v52 = vld [vmem:[#allocation5 + $0x2c8] sm:$0xff] }
  0xa6   :  { %v613_v9 = vadd.f32 %v612_v4, %v486_v62  ;;  %v373_v62 = vsub.f32 %v117_v55, %v245_v56  ;;  %v500_v4 = vand.u32 2147483647, %v372_v57  ;;  %v130_v56 = vld [vmem:[#allocation2 + $0x2d0] sm:$0xff] }
  0xa7   :  { %v258_v57 = vld [vmem:[#allocation5 + $0x2d0] sm:$0xff] }
  0xa8   :  { %v614_v14 = vadd.f32 %v613_v9, %v487_v3  ;;  %v374_v3 = vsub.f32 %v118_v60, %v246_v61  ;;  %v501_v9 = vand.u32 2147483647, %v373_v62  ;;  %v131_v61 = vld [vmem:[#allocation2 + $0x2d8] sm:$0xff] }
  0xa9   :  { %v259_v62 = vld [vmem:[#allocation5 + $0x2d8] sm:$0xff] }
  0xaa   :  { %v615_v19 = vadd.f32 %v614_v14, %v488_v8  ;;  %v375_v8 = vsub.f32 %v119_v1, %v247_v2  ;;  %v502_v14 = vand.u32 2147483647, %v374_v3  ;;  %v132_v2 = vld [vmem:[#allocation2 + $0x2e0] sm:$0xff] }
  0xab   :  { %v260_v3 = vld [vmem:[#allocation5 + $0x2e0] sm:$0xff] }
  0xac   :  { %v616_v24 = vadd.f32 %v615_v19, %v489_v13  ;;  %v376_v13 = vsub.f32 %v120_v6, %v248_v7  ;;  %v503_v19 = vand.u32 2147483647, %v375_v8  ;;  %v133_v7 = vld [vmem:[#allocation2 + $0x2e8] sm:$0xff] }
  0xad   :  { %v261_v8 = vld [vmem:[#allocation5 + $0x2e8] sm:$0xff] }
  0xae   :  { %v617_v29 = vadd.f32 %v616_v24, %v490_v18  ;;  %v377_v18 = vsub.f32 %v121_v11, %v249_v12  ;;  %v504_v24 = vand.u32 2147483647, %v376_v13  ;;  %v134_v12 = vld [vmem:[#allocation2 + $0x2f0] sm:$0xff] }
  0xaf   :  { %v262_v13 = vld [vmem:[#allocation5 + $0x2f0] sm:$0xff] }
  0xb0   :  { %v618_v34 = vadd.f32 %v617_v29, %v491_v23  ;;  %v378_v23 = vsub.f32 %v122_v16, %v250_v17  ;;  %v505_v29 = vand.u32 2147483647, %v377_v18  ;;  %v135_v17 = vld [vmem:[#allocation2 + $0x2f8] sm:$0xff] }
  0xb1   :  { %v263_v18 = vld [vmem:[#allocation5 + $0x2f8] sm:$0xff] }
  0xb2   :  { %v619_v39 = vadd.f32 %v618_v34, %v492_v28  ;;  %v379_v28 = vsub.f32 %v123_v21, %v251_v22  ;;  %v506_v34 = vand.u32 2147483647, %v378_v23  ;;  %v136_v22 = vld [vmem:[#allocation2 + $0x300] sm:$0xff] }
  0xb3   :  { %v264_v23 = vld [vmem:[#allocation5 + $0x300] sm:$0xff] }
  0xb4   :  { %v620_v44 = vadd.f32 %v619_v39, %v493_v33  ;;  %v380_v33 = vsub.f32 %v124_v26, %v252_v27  ;;  %v507_v39 = vand.u32 2147483647, %v379_v28  ;;  %v137_v27 = vld [vmem:[#allocation2 + $0x308] sm:$0xff] }
  0xb5   :  { %v265_v28 = vld [vmem:[#allocation5 + $0x308] sm:$0xff] }
  0xb6   :  { %v621_v49 = vadd.f32 %v620_v44, %v494_v38  ;;  %v381_v38 = vsub.f32 %v125_v31, %v253_v32  ;;  %v508_v44 = vand.u32 2147483647, %v380_v33  ;;  %v138_v32 = vld [vmem:[#allocation2 + $0x310] sm:$0xff] }
  0xb7   :  { %v266_v33 = vld [vmem:[#allocation5 + $0x310] sm:$0xff] }
  0xb8   :  { %v622_v54 = vadd.f32 %v621_v49, %v495_v43  ;;  %v382_v43 = vsub.f32 %v126_v36, %v254_v37  ;;  %v509_v49 = vand.u32 2147483647, %v381_v38  ;;  %v139_v37 = vld [vmem:[#allocation2 + $0x318] sm:$0xff] }
  0xb9   :  { %v267_v38 = vld [vmem:[#allocation5 + $0x318] sm:$0xff] }
  0xba   :  { %v623_v59 = vadd.f32 %v622_v54, %v496_v48  ;;  %v383_v48 = vsub.f32 %v127_v41, %v255_v42  ;;  %v510_v54 = vand.u32 2147483647, %v382_v43  ;;  %v140_v42 = vld [vmem:[#allocation2 + $0x320] sm:$0xff] }
  0xbb   :  { %v268_v43 = vld [vmem:[#allocation5 + $0x320] sm:$0xff] }
  0xbc   :  { %v624_v0 = vadd.f32 %v623_v59, %v497_v53  ;;  %v384_v53 = vsub.f32 %v128_v46, %v256_v47  ;;  %v511_v59 = vand.u32 2147483647, %v383_v48  ;;  %v141_v47 = vld [vmem:[#allocation2 + $0x328] sm:$0xff] }
  0xbd   :  { %v269_v48 = vld [vmem:[#allocation5 + $0x328] sm:$0xff] }
  0xbe   :  { %v625_v5 = vadd.f32 %v624_v0, %v498_v58  ;;  %v385_v58 = vsub.f32 %v129_v51, %v257_v52  ;;  %v512_v0 = vand.u32 2147483647, %v384_v53  ;;  %v142_v52 = vld [vmem:[#allocation2 + $0x330] sm:$0xff] }
  0xbf   :  { %v270_v53 = vld [vmem:[#allocation5 + $0x330] sm:$0xff] }
  0xc0   :  { %v626_v10 = vadd.f32 %v625_v5, %v499_v63  ;;  %v386_v63 = vsub.f32 %v130_v56, %v258_v57  ;;  %v513_v5 = vand.u32 2147483647, %v385_v58  ;;  %v143_v57 = vld [vmem:[#allocation2 + $0x338] sm:$0xff] }
  0xc1   :  { %v271_v58 = vld [vmem:[#allocation5 + $0x338] sm:$0xff] }
  0xc2   :  { %v627_v15 = vadd.f32 %v626_v10, %v500_v4  ;;  %v387_v4 = vsub.f32 %v131_v61, %v259_v62  ;;  %v514_v10 = vand.u32 2147483647, %v386_v63  ;;  %v144_v62 = vld [vmem:[#allocation2 + $0x340] sm:$0xff] }
  0xc3   :  { %v272_v63 = vld [vmem:[#allocation5 + $0x340] sm:$0xff] }
  0xc4   :  { %v628_v20 = vadd.f32 %v627_v15, %v501_v9  ;;  %v388_v9 = vsub.f32 %v132_v2, %v260_v3  ;;  %v515_v15 = vand.u32 2147483647, %v387_v4  ;;  %v145_v3 = vld [vmem:[#allocation2 + $0x348] sm:$0xff] }
  0xc5   :  { %v273_v4 = vld [vmem:[#allocation5 + $0x348] sm:$0xff] }
  0xc6   :  { %v629_v25 = vadd.f32 %v628_v20, %v502_v14  ;;  %v389_v14 = vsub.f32 %v133_v7, %v261_v8  ;;  %v516_v20 = vand.u32 2147483647, %v388_v9  ;;  %v146_v8 = vld [vmem:[#allocation2 + $0x350] sm:$0xff] }
  0xc7   :  { %v274_v9 = vld [vmem:[#allocation5 + $0x350] sm:$0xff] }
  0xc8   :  { %v630_v30 = vadd.f32 %v629_v25, %v503_v19  ;;  %v390_v19 = vsub.f32 %v134_v12, %v262_v13  ;;  %v517_v25 = vand.u32 2147483647, %v389_v14  ;;  %v147_v13 = vld [vmem:[#allocation2 + $0x358] sm:$0xff] }
  0xc9   :  { %v275_v14 = vld [vmem:[#allocation5 + $0x358] sm:$0xff] }
  0xca   :  { %v631_v35 = vadd.f32 %v630_v30, %v504_v24  ;;  %v391_v24 = vsub.f32 %v135_v17, %v263_v18  ;;  %v518_v30 = vand.u32 2147483647, %v390_v19  ;;  %v148_v18 = vld [vmem:[#allocation2 + $0x360] sm:$0xff] }
  0xcb   :  { %v276_v19 = vld [vmem:[#allocation5 + $0x360] sm:$0xff] }
  0xcc   :  { %v632_v40 = vadd.f32 %v631_v35, %v505_v29  ;;  %v392_v29 = vsub.f32 %v136_v22, %v264_v23  ;;  %v519_v35 = vand.u32 2147483647, %v391_v24  ;;  %v149_v23 = vld [vmem:[#allocation2 + $0x368] sm:$0xff] }
  0xcd   :  { %v277_v24 = vld [vmem:[#allocation5 + $0x368] sm:$0xff] }
  0xce   :  { %v633_v45 = vadd.f32 %v632_v40, %v506_v34  ;;  %v393_v34 = vsub.f32 %v137_v27, %v265_v28  ;;  %v520_v40 = vand.u32 2147483647, %v392_v29  ;;  %v150_v28 = vld [vmem:[#allocation2 + $0x370] sm:$0xff] }
  0xcf   :  { %v278_v29 = vld [vmem:[#allocation5 + $0x370] sm:$0xff] }
  0xd0   :  { %v634_v50 = vadd.f32 %v633_v45, %v507_v39  ;;  %v394_v39 = vsub.f32 %v138_v32, %v266_v33  ;;  %v521_v45 = vand.u32 2147483647, %v393_v34  ;;  %v151_v33 = vld [vmem:[#allocation2 + $0x378] sm:$0xff] }
  0xd1   :  { %v279_v34 = vld [vmem:[#allocation5 + $0x378] sm:$0xff] }
  0xd2   :  { %v635_v55 = vadd.f32 %v634_v50, %v508_v44  ;;  %v395_v44 = vsub.f32 %v139_v37, %v267_v38  ;;  %v522_v50 = vand.u32 2147483647, %v394_v39  ;;  %v152_v38 = vld [vmem:[#allocation2 + $0x380] sm:$0xff] }
  0xd3   :  { %v280_v39 = vld [vmem:[#allocation5 + $0x380] sm:$0xff] }
  0xd4   :  { %v636_v60 = vadd.f32 %v635_v55, %v509_v49  ;;  %v396_v49 = vsub.f32 %v140_v42, %v268_v43  ;;  %v523_v55 = vand.u32 2147483647, %v395_v44  ;;  %v153_v43 = vld [vmem:[#allocation2 + $0x388] sm:$0xff] }
  0xd5   :  { %v281_v44 = vld [vmem:[#allocation5 + $0x388] sm:$0xff] }
  0xd6   :  { %v637_v1 = vadd.f32 %v636_v60, %v510_v54  ;;  %v397_v54 = vsub.f32 %v141_v47, %v269_v48  ;;  %v524_v60 = vand.u32 2147483647, %v396_v49  ;;  %v154_v48 = vld [vmem:[#allocation2 + $0x390] sm:$0xff] }
  0xd7   :  { %v282_v49 = vld [vmem:[#allocation5 + $0x390] sm:$0xff] }
  0xd8   :  { %v638_v6 = vadd.f32 %v637_v1, %v511_v59  ;;  %v398_v59 = vsub.f32 %v142_v52, %v270_v53  ;;  %v525_v1 = vand.u32 2147483647, %v397_v54  ;;  %v155_v53 = vld [vmem:[#allocation2 + $0x398] sm:$0xff] }
  0xd9   :  { %v283_v54 = vld [vmem:[#allocation5 + $0x398] sm:$0xff] }
  0xda   :  { %v639_v11 = vadd.f32 %v638_v6, %v512_v0  ;;  %v399_v0 = vsub.f32 %v143_v57, %v271_v58  ;;  %v526_v6 = vand.u32 2147483647, %v398_v59  ;;  %v156_v58 = vld [vmem:[#allocation2 + $0x3a0] sm:$0xff] }
  0xdb   :  { %v284_v59 = vld [vmem:[#allocation5 + $0x3a0] sm:$0xff] }
  0xdc   :  { %v640_v16 = vadd.f32 %v639_v11, %v513_v5  ;;  %v400_v5 = vsub.f32 %v144_v62, %v272_v63  ;;  %v527_v11 = vand.u32 2147483647, %v399_v0  ;;  %v157_v63 = vld [vmem:[#allocation2 + $0x3a8] sm:$0xff] }
  0xdd   :  { %v285_v0 = vld [vmem:[#allocation5 + $0x3a8] sm:$0xff] }
  0xde   :  { %v641_v21 = vadd.f32 %v640_v16, %v514_v10  ;;  %v401_v10 = vsub.f32 %v145_v3, %v273_v4  ;;  %v528_v16 = vand.u32 2147483647, %v400_v5  ;;  %v158_v4 = vld [vmem:[#allocation2 + $0x3b0] sm:$0xff] }
  0xdf   :  { %v286_v5 = vld [vmem:[#allocation5 + $0x3b0] sm:$0xff] }
  0xe0   :  { %v642_v26 = vadd.f32 %v641_v21, %v515_v15  ;;  %v402_v15 = vsub.f32 %v146_v8, %v274_v9  ;;  %v529_v21 = vand.u32 2147483647, %v401_v10  ;;  %v159_v9 = vld [vmem:[#allocation2 + $0x3b8] sm:$0xff] }
  0xe1   :  { %v287_v10 = vld [vmem:[#allocation5 + $0x3b8] sm:$0xff] }
  0xe2   :  { %v643_v31 = vadd.f32 %v642_v26, %v516_v20  ;;  %v403_v20 = vsub.f32 %v147_v13, %v275_v14  ;;  %v530_v26 = vand.u32 2147483647, %v402_v15  ;;  %v160_v14 = vld [vmem:[#allocation2 + $0x3c0] sm:$0xff] }
  0xe3   :  { %v288_v15 = vld [vmem:[#allocation5 + $0x3c0] sm:$0xff] }
  0xe4   :  { %v644_v36 = vadd.f32 %v643_v31, %v517_v25  ;;  %v404_v25 = vsub.f32 %v148_v18, %v276_v19  ;;  %v531_v31 = vand.u32 2147483647, %v403_v20  ;;  %v161_v19 = vld [vmem:[#allocation2 + $0x3c8] sm:$0xff] }
  0xe5   :  { %v289_v20 = vld [vmem:[#allocation5 + $0x3c8] sm:$0xff] }
  0xe6   :  { %v645_v41 = vadd.f32 %v644_v36, %v518_v30  ;;  %v405_v30 = vsub.f32 %v149_v23, %v277_v24  ;;  %v532_v36 = vand.u32 2147483647, %v404_v25  ;;  %v162_v24 = vld [vmem:[#allocation2 + $0x3d0] sm:$0xff] }
  0xe7   :  { %v290_v25 = vld [vmem:[#allocation5 + $0x3d0] sm:$0xff] }
  0xe8   :  { %v646_v46 = vadd.f32 %v645_v41, %v519_v35  ;;  %v406_v35 = vsub.f32 %v150_v28, %v278_v29  ;;  %v533_v41 = vand.u32 2147483647, %v405_v30  ;;  %v163_v29 = vld [vmem:[#allocation2 + $0x3d8] sm:$0xff] }
  0xe9   :  { %v291_v30 = vld [vmem:[#allocation5 + $0x3d8] sm:$0xff] }
  0xea   :  { %v647_v51 = vadd.f32 %v646_v46, %v520_v40  ;;  %v407_v40 = vsub.f32 %v151_v33, %v279_v34  ;;  %v534_v46 = vand.u32 2147483647, %v406_v35  ;;  %v164_v34 = vld [vmem:[#allocation2 + $0x3e0] sm:$0xff] }
  0xeb   :  { %v292_v35 = vld [vmem:[#allocation5 + $0x3e0] sm:$0xff] }
  0xec   :  { %v648_v56 = vadd.f32 %v647_v51, %v521_v45  ;;  %v408_v45 = vsub.f32 %v152_v38, %v280_v39  ;;  %v535_v51 = vand.u32 2147483647, %v407_v40  ;;  %v165_v39 = vld [vmem:[#allocation2 + $0x3e8] sm:$0xff] }
  0xed   :  { %v293_v40 = vld [vmem:[#allocation5 + $0x3e8] sm:$0xff] }
  0xee   :  { %v649_v61 = vadd.f32 %v648_v56, %v522_v50  ;;  %v409_v50 = vsub.f32 %v153_v43, %v281_v44  ;;  %v536_v56 = vand.u32 2147483647, %v408_v45  ;;  %v166_v44 = vld [vmem:[#allocation2 + $0x3f0] sm:$0xff] }
  0xef   :  { %v294_v45 = vld [vmem:[#allocation5 + $0x3f0] sm:$0xff] }
  0xf0   :  { %v650_v2 = vadd.f32 %v649_v61, %v523_v55  ;;  %v410_v55 = vsub.f32 %v154_v48, %v282_v49  ;;  %v537_v61 = vand.u32 2147483647, %v409_v50  ;;  %v167_v49 = vld [vmem:[#allocation2 + $0x3f8] sm:$0xff] }
  0xf1   :  { %v295_v50 = vld [vmem:[#allocation5 + $0x3f8] sm:$0xff] }
  0xf2   :  { %v651_v7 = vadd.f32 %v650_v2, %v524_v60  ;;  %v411_v60 = vsub.f32 %v155_v53, %v283_v54  ;;  %v538_v2 = vand.u32 2147483647, %v410_v55  ;;  %v423_v54 = vsub.f32 %v167_v49, %v295_v50 }
  0xf4   :  { %v652_v12 = vadd.f32 %v651_v7, %v525_v1  ;;  %v412_v1 = vsub.f32 %v156_v58, %v284_v59  ;;  %v539_v7 = vand.u32 2147483647, %v411_v60  ;;  %v551_v59 = vand.u32 2147483647, %v423_v54 }
  0xf6   :  { %v653_v17 = vadd.f32 %v652_v12, %v526_v6  ;;  %v413_v6 = vsub.f32 %v157_v63, %v285_v0  ;;  %v540_v12 = vand.u32 2147483647, %v412_v1 }
  0xf8   :  { %v654_v22 = vadd.f32 %v653_v17, %v527_v11  ;;  %v414_v11 = vsub.f32 %v158_v4, %v286_v5  ;;  %v541_v17 = vand.u32 2147483647, %v413_v6  ;;  %v688_v6 = vlaneseq }
  0xfa   :  { %v655_v27 = vadd.f32 %v654_v22, %v528_v16  ;;  %v415_v16 = vsub.f32 %v159_v9, %v287_v10  ;;  %v542_v22 = vand.u32 2147483647, %v414_v11 }
  0xfc   :  { %v656_v32 = vadd.f32 %v655_v27, %v529_v21  ;;  %v416_v21 = vsub.f32 %v160_v14, %v288_v15  ;;  %v543_v27 = vand.u32 2147483647, %v415_v16 }
  0xfe   :  { %v657_v37 = vadd.f32 %v656_v32, %v530_v26  ;;  %v417_v26 = vsub.f32 %v161_v19, %v289_v20  ;;  %v544_v32 = vand.u32 2147483647, %v416_v21 }
 0x100   :  { %v658_v42 = vadd.f32 %v657_v37, %v531_v31  ;;  %v418_v31 = vsub.f32 %v162_v24, %v290_v25  ;;  %v545_v37 = vand.u32 2147483647, %v417_v26 }
 0x102   :  { %v659_v47 = vadd.f32 %v658_v42, %v532_v36  ;;  %v419_v36 = vsub.f32 %v163_v29, %v291_v30  ;;  %v546_v42 = vand.u32 2147483647, %v418_v31 }
 0x104   :  { %v660_v52 = vadd.f32 %v659_v47, %v533_v41  ;;  %v420_v41 = vsub.f32 %v164_v34, %v292_v35  ;;  %v547_v47 = vand.u32 2147483647, %v419_v36 }
 0x106   :  { %v661_v57 = vadd.f32 %v660_v52, %v534_v46  ;;  %v421_v46 = vsub.f32 %v165_v39, %v293_v40  ;;  %v548_v52 = vand.u32 2147483647, %v420_v41 }
 0x108   :  { %v662_v62 = vadd.f32 %v661_v57, %v535_v51  ;;  %v422_v51 = vsub.f32 %v166_v44, %v294_v45  ;;  %v549_v55 = vand.u32 2147483647, %v421_v46 }
 0x10a   :  { %v663_v3 = vadd.f32 %v662_v62, %v536_v56  ;;  %v550_v57 = vand.u32 2147483647, %v422_v51 }
 0x10c   :  { %v664_v8 = vadd.f32 %v663_v3, %v537_v61 }
 0x10e   :  { %v665_v13 = vadd.f32 %v664_v8, %v538_v2  ;;  %v691_v8 = vand.u32 127, %v688_v6 }
 0x110   :  { %v666_v18 = vadd.f32 %v665_v13, %v539_v7  ;;  %v689_v7 = vshrl.u32 %v688_v6, 7  ;;  %vm693_vm1 = vcmp.eq.s32.totalorder %v691_v8, 0 }
 0x112   :  { %v667_v23 = vadd.f32 %v666_v18, %v540_v12  ;;  %vm692_vm0 = vcmp.eq.s32.totalorder %v689_v7, 0 }
 0x113   :  { %vm694_vm2 = vmand %vm692_vm0, %vm693_vm1 }
 0x114   :  { %v668_v28 = vadd.f32 %v667_v23, %v541_v17 }
 0x116   :  { %v669_v33 = vadd.f32 %v668_v28, %v542_v22 }
 0x118   :  { %v670_v38 = vadd.f32 %v669_v33, %v543_v27 }
 0x11a   :  { %v671_v43 = vadd.f32 %v670_v38, %v544_v32 }
 0x11c   :  { %v672_v48 = vadd.f32 %v671_v43, %v545_v37 }
 0x11e   :  { %v673_v53 = vadd.f32 %v672_v48, %v546_v42 }
 0x120   :  { %v674_v56 = vadd.f32 %v673_v53, %v547_v47 }
 0x122   :  { %v675_v58 = vadd.f32 %v674_v56, %v548_v52 }
 0x124   :  { %v676_v60 = vadd.f32 %v675_v58, %v549_v55 }
 0x126   :  { %v677_v61 = vadd.f32 %v676_v60, %v550_v57 }
 0x128   :  { %v678_v62 = vadd.f32 %v677_v61, %v551_v59 }
 0x12a   :  { %679 = vadd.xlane.f32.xlu0 %v678_v62 }
 0x1b7   :  { %v680_v63 = vpop.xlane.xlu0 %679 }
 0x1b8   :  { %v681_v0 = vrot.slane %v680_v63, 4 }
 0x1ba   :  { %v682_v1 = vadd.f32 %v681_v0, %v680_v63 }
 0x1bc   :  { %v683_v2 = vrot.slane %v682_v1, 2 }
 0x1be   :  { %v684_v3 = vadd.f32 %v683_v2, %v682_v1 }
 0x1c0   :  { %v685_v4 = vrot.slane %v684_v3, 1 }
 0x1c2   :  { %v686_v5 = vadd.f32 %v685_v4, %v684_v3 }
 0x1c4   :  { %714 = vpush %v686_v5 }
 0x1f5   :  { %s715_s7 = spop %714 }
 0x1f6   :  { %v695_v9 = vstv %s715_s7 }
 0x1f7   :  { %v696_v10 = vsel %vm694_vm2, %v695_v9, 0.0 }
 0x1f8   :  { %697 = vst [vmem:[#allocation7] sm:$0xff] %v696_v10 }
 0x1f9   :  { %776 = shalt.err (!%p773_p6)
}
 0x1fa   :  { %s777_s11 = scalar_lea.hbm %s851_s2, 128 }
 0x1fb   :  { %p778_p7 = scmp.ne.s32.totalorder %s851_s2, %s777_s11  ;;  %p781_p8 = scmp.lt.u32.totalorder %s777_s11, %s851_s2 }
 0x1fd   :  { %p783_p9 = pnand %p781_p8, %p778_p7 }
 0x1ff   :  { %786 = shalt.err (!%p783_p9)
}
 0x200   :  { %707 = dma.vmem_to_hbm [thread:$0]  %s705_s6, 128, %s851_s2, [#allocation4]  }
 0x201   :  { %791 = dma.done.wait [#allocation4], 128  }
 0x202   :  { %792 = vsyncadd [#allocation4], 4294967168 }
 0x203   :  { %711 = vsyncpa [#allocation3], 1 }
 0x204   :  { %712 = vsyncpa [#allocation6], 1 }
 0x205   :  { %713 = vsyncpa [#allocation4], 1 }

</bundles_post_ra>
